<compile_context>
chip_gen: v7x
topology: tpu7x:2x2x1
jax: 0.10.0
libtpu: 0.0.40
codegen_flags: <defaults>
</compile_context>

<pallas_src>
import functools
import math

import jax
import jax.numpy as jnp
from jax import lax
from jax.experimental import pallas as pl
from jax.experimental.pallas import tpu as pltpu


def _round_up(x, m):
    return ((x + m - 1) // m) * m


def _conv1d_kernel(x_ref, halo_ref, w_ref, b_ref, o_ref, *, kernel_size, l_tile):
    """One (batch, L-tile) grid step of the 1-D conv in NCL layout.

    x_ref:    (1, C_in, TL)       main input tile (length on the lane axis)
    halo_ref: (1, 1, C_in, K-1)   right-halo columns for this tile
    w_ref:    (C_out, K*C_in)     all K taps folded into one contraction
    b_ref:    (C_out, 1)          bias, f32
    o_ref:    (1, C_out, TL)      lane-dense output tile
    """
    # (C_in, TL + K - 1) window for this tile: main block + halo tail.
    x = jnp.concatenate([x_ref[0], halo_ref[0, 0]], axis=-1)
    # Stack the K shifted views along the contraction axis: row t*C_in + ci
    # holds x_window[ci, l + t].  One MXU matmul of depth K*C_in replaces K
    # shallow depth-C_in matmuls.
    xk = jnp.concatenate(
        [x[:, t:t + l_tile] for t in range(kernel_size)], axis=0)   # (K*C_in, TL)
    acc = jnp.dot(w_ref[...], xk, preferred_element_type=jnp.float32)  # (C_out, TL) f32
    o_ref[0] = (acc + b_ref[...]).astype(o_ref.dtype)


def conv_norm_forward(x_ncl, weight, bias, *, padding=2, l_tile=512,
                      compute_dtype=None):
    """ConvNorm forward == nn.Conv1d(C_in, C_out, K, stride=1, padding, dilation=1).

    x_ncl:  (N, C_in, L)      same layout as the PyTorch module input
    weight: (C_out, C_in, K)  PyTorch Conv1d weight layout
    bias:   (C_out,)
    Returns (N, C_out, L_out) with L_out = L + 2*padding - K + 1.
    """
    n, c_in, length = x_ncl.shape
    c_out, c_in_w, k = weight.shape
    assert c_in == c_in_w
    out_dtype = x_ncl.dtype
    if compute_dtype is None:
        compute_dtype = out_dtype

    l_out = length + 2 * padding - k + 1
    # Length tile: multiple of 128 (lane-dense stores), capped by the padded
    # output length so short sequences use a single tile.
    tl = min(max(128, (l_tile // 128) * 128), _round_up(l_out, 128))
    n_tiles = pl.cdiv(l_out, tl)
    l_out_pad = n_tiles * tl

    # One zero-pad of the length axis: conv padding + round-up to the tile grid
    # + K-1 extra columns so every tile's halo gather stays in bounds (VMEM/HBM
    # reads have no runtime bounds check).
    # TODO(synk): fold this zero-padding into the kernel with edge masking to
    # remove the remaining wrapper-side input copy.
    total_len = l_out_pad + k - 1
    x_pad = jnp.pad(
        x_ncl, ((0, 0), (0, 0), (padding, total_len - padding - length))
    ).astype(compute_dtype)
    x_main = x_pad[:, :, :l_out_pad]                               # (N, C_in, n_tiles*TL)
    # Right-halo columns of tile j: x_pad[:, :, (j+1)*TL : (j+1)*TL + K - 1].
    idx = (jnp.arange(1, n_tiles + 1) * tl)[:, None] + jnp.arange(k - 1)[None, :]
    x_halo = jnp.transpose(x_pad[:, :, idx], (0, 2, 1, 3))         # (N, n_tiles, C_in, K-1)

    # Fold taps into the contraction: w2[co, t*C_in + ci] = weight[co, ci, t].
    w2 = jnp.transpose(weight, (0, 2, 1)).reshape(c_out, k * c_in).astype(compute_dtype)
    b2 = bias.reshape(c_out, 1).astype(jnp.float32)

    kernel = functools.partial(_conv1d_kernel, kernel_size=k, l_tile=tl)

    in_bytes = jnp.dtype(compute_dtype).itemsize
    out_bytes = jnp.dtype(out_dtype).itemsize
    # VMEM budget: double-buffered in/out tiles + resident weights/bias.
    # Clamp to 32 MiB so the same tiling is safe on v7x's 64 MiB VMEM.
    vmem_est = (2 * (c_in * tl + c_in * (k - 1)) * in_bytes
                + 2 * c_out * tl * out_bytes
                + c_out * k * c_in * in_bytes + c_out * 4)
    vmem_limit = int(min(max(4 * vmem_est, 8 << 20), 32 << 20))

    cost = pl.CostEstimate(
        flops=2 * n * l_out_pad * k * c_in * c_out,
        transcendentals=0,
        bytes_accessed=(x_main.size * in_bytes + x_halo.size * in_bytes
                        + w2.size * in_bytes + b2.size * 4
                        + n * c_out * l_out_pad * out_bytes))

    out = pl.pallas_call(
        kernel,
        out_shape=jax.ShapeDtypeStruct((n, c_out, l_out_pad), out_dtype),
        grid_spec=pltpu.PrefetchScalarGridSpec(
            num_scalar_prefetch=0,
            grid=(n, n_tiles),
            in_specs=[
                pl.BlockSpec((1, c_in, tl), lambda b, j: (b, 0, j)),
                pl.BlockSpec((1, 1, c_in, k - 1), lambda b, j: (b, j, 0, 0)),
                pl.BlockSpec((c_out, k * c_in), lambda b, j: (0, 0)),
                pl.BlockSpec((c_out, 1), lambda b, j: (0, 0)),
            ],
            out_specs=pl.BlockSpec((1, c_out, tl), lambda b, j: (b, 0, j)),
        ),
        compiler_params=pltpu.CompilerParams(
            dimension_semantics=("parallel", "parallel"),
            vmem_limit_bytes=vmem_limit),
        cost_estimate=cost,
    )(x_main, x_halo, w2, b2)

    return out[:, :, :l_out]


def init_conv_norm_params(key, in_channels, out_channels, kernel_size=5):
    """Deterministic param init mirroring the PyTorch module's __init__."""
    kw, kb = jax.random.split(key)
    fan_in = in_channels * kernel_size
    fan_out = out_channels * kernel_size
    gain = 5.0 / 3.0  # nn.init.calculate_gain('tanh')
    std = gain * math.sqrt(2.0 / (fan_in + fan_out))
    weight = std * jax.random.normal(
        kw, (out_channels, in_channels, kernel_size), dtype=jnp.float32)
    bound = 1.0 / math.sqrt(fan_in)  # PyTorch Conv1d default bias init
    bias = jax.random.uniform(
        kb, (out_channels,), minval=-bound, maxval=bound, dtype=jnp.float32)
    return weight, bias


if __name__ == "__main__":
    key = jax.random.PRNGKey(0)
    k_x, k_p = jax.random.split(key)

    batch, in_channels, out_channels, length = 2, 4, 8, 16
    kernel_size, padding = 5, 2

    x = jax.random.normal(k_x, (batch, in_channels, length), dtype=jnp.float32)
    weight, bias = init_conv_norm_params(k_p, in_channels, out_channels, kernel_size)

    # f32 path (matches nn.Conv1d numerics).
    out = jax.block_until_ready(conv_norm_forward(x, weight, bias, padding=padding))

    ref = lax.conv_general_dilated(
        x, weight, window_strides=(1,), padding=[(padding, padding)],
        dimension_numbers=("NCH", "OIH", "NCH")) + bias[None, :, None]
    assert out.shape == (batch, out_channels, length), out.shape
    assert jnp.allclose(out, ref, atol=1e-5, rtol=1e-5)

    # bf16 MXU path (halves HBM traffic; f32 accumulate + bias) -- loose check.
    out_bf16 = jax.block_until_ready(
        conv_norm_forward(x, weight, bias, padding=padding,
                          compute_dtype=jnp.bfloat16))
    assert out_bf16.shape == (batch, out_channels, length), out_bf16.shape
    assert jnp.allclose(out_bf16, ref, atol=5e-2, rtol=5e-2)

    print("KERNEL_OK")
</pallas_src>

<mosaic_0001>
module attributes {stable_mosaic.version = 11 : i64} {
  func.func @_conv1d_kernel(%arg0: i32, %arg1: i32, %arg2: memref<1x4x128xf32, #tpu.memory_space<vmem>>, %arg3: memref<1x1x4x4xf32, #tpu.memory_space<vmem>>, %arg4: memref<8x20xf32, #tpu.memory_space<vmem>>, %arg5: memref<8x1xf32, #tpu.memory_space<vmem>>, %arg6: memref<1x8x128xf32, #tpu.memory_space<vmem>>) attributes {dimension_semantics = [#tpu.dimension_semantics<parallel>, #tpu.dimension_semantics<parallel>], iteration_bounds = array<i64: 2, 1>, scalar_prefetch = 0 : i64, scratch_operands = 0 : i64, tpu.core_type = #tpu.core_type<tc>, window_params = [{transform_indices = @transform_0, window_bounds = array<i64: 1, 4, 128>}, {transform_indices = @transform_1, window_bounds = array<i64: 1, 1, 4, 4>}, {pipeline_mode = #tpu.pipeline_mode<synchronous>, transform_indices = @transform_2, window_bounds = array<i64: 8, 20>}, {pipeline_mode = #tpu.pipeline_mode<synchronous>, transform_indices = @transform_3, window_bounds = array<i64: 8, 1>}, {transform_indices = @transform_4, window_bounds = array<i64: 1, 8, 128>}]} {
    %c0 = arith.constant 0 : index
    %c0_0 = arith.constant 0 : index
    %c0_1 = arith.constant 0 : index
    %0 = vector.load %arg2[%c0, %c0_0, %c0_1] : memref<1x4x128xf32, #tpu.memory_space<vmem>>, vector<1x4x128xf32>
    %1 = vector.shape_cast %0 : vector<1x4x128xf32> to vector<4x128xf32>
    %c0_2 = arith.constant 0 : index
    %c0_3 = arith.constant 0 : index
    %c0_4 = arith.constant 0 : index
    %c0_5 = arith.constant 0 : index
    %2 = vector.load %arg3[%c0_2, %c0_3, %c0_4, %c0_5] : memref<1x1x4x4xf32, #tpu.memory_space<vmem>>, vector<1x1x4x4xf32>
    %3 = vector.shape_cast %2 : vector<1x1x4x4xf32> to vector<4x4xf32>
    %4 = tpu.concatenate %1, %3 in 1 : vector<4x128xf32>, vector<4x4xf32> -> vector<4x132xf32>
    %5 = vector.extract_strided_slice %4 {offsets = [0, 0], sizes = [4, 128], strides = [1, 1]} : vector<4x132xf32> to vector<4x128xf32>
    %6 = vector.extract_strided_slice %4 {offsets = [0, 1], sizes = [4, 128], strides = [1, 1]} : vector<4x132xf32> to vector<4x128xf32>
    %7 = vector.extract_strided_slice %4 {offsets = [0, 2], sizes = [4, 128], strides = [1, 1]} : vector<4x132xf32> to vector<4x128xf32>
    %8 = vector.extract_strided_slice %4 {offsets = [0, 3], sizes = [4, 128], strides = [1, 1]} : vector<4x132xf32> to vector<4x128xf32>
    %9 = vector.extract_strided_slice %4 {offsets = [0, 4], sizes = [4, 128], strides = [1, 1]} : vector<4x132xf32> to vector<4x128xf32>
    %10 = tpu.concatenate %5, %6, %7, %8, %9 in 0 : vector<4x128xf32>, vector<4x128xf32>, vector<4x128xf32>, vector<4x128xf32>, vector<4x128xf32> -> vector<20x128xf32>
    %c0_6 = arith.constant 0 : index
    %c0_7 = arith.constant 0 : index
    %11 = vector.load %arg4[%c0_6, %c0_7] : memref<8x20xf32, #tpu.memory_space<vmem>>, vector<8x20xf32>
    %cst = arith.constant dense<0.000000e+00> : vector<8x128xf32>
    %12 = tpu.matmul %11, %10, %cst {dimension_numbers = #tpu.dot_dimension_numbers<[1], [0], [0], [1], [0, 0, 1, 1], [], []>} : vector<8x20xf32>, vector<20x128xf32>, vector<8x128xf32> -> vector<8x128xf32>
    %c0_8 = arith.constant 0 : index
    %c0_9 = arith.constant 0 : index
    %13 = vector.load %arg5[%c0_8, %c0_9] : memref<8x1xf32, #tpu.memory_space<vmem>>, vector<8x1xf32>
    %14 = vector.broadcast %13 : vector<8x1xf32> to vector<8x128xf32>
    %15 = arith.addf %12, %14 : vector<8x128xf32>
    %c0_10 = arith.constant 0 : index
    %c0_11 = arith.constant 0 : index
    %c0_12 = arith.constant 0 : index
    %16 = vector.load %arg6[%c0_10, %c0_11, %c0_12] : memref<1x8x128xf32, #tpu.memory_space<vmem>>, vector<1x8x128xf32>
    %17 = vector.shape_cast %16 : vector<1x8x128xf32> to vector<8x128xf32>
    %18 = vector.shape_cast %15 : vector<8x128xf32> to vector<1x8x128xf32>
    tpu.vector_store %arg6[%c0_10, %c0_11, %c0_12], %18 {strides = array<i32>} : memref<1x8x128xf32, #tpu.memory_space<vmem>>, vector<1x8x128xf32>,
    return
  }
  func.func @transform_0(%arg0: i32, %arg1: i32) -> (i32, i32, i32) {
    %c0_i32 = arith.constant 0 : i32
    %c0_i32_0 = arith.constant 0 : i32
    return %arg0, %c0_i32, %arg1 : i32, i32, i32
  }
  func.func @transform_1(%arg0: i32, %arg1: i32) -> (i32, i32, i32, i32) {
    %c0_i32 = arith.constant 0 : i32
    %c0_i32_0 = arith.constant 0 : i32
    %c0_i32_1 = arith.constant 0 : i32
    return %arg0, %arg1, %c0_i32, %c0_i32_0 : i32, i32, i32, i32
  }
  func.func @transform_2(%arg0: i32, %arg1: i32) -> (i32, i32) {
    %c0_i32 = arith.constant 0 : i32
    %c0_i32_0 = arith.constant 0 : i32
    %c0_i32_1 = arith.constant 0 : i32
    return %c0_i32, %c0_i32_0 : i32, i32
  }
  func.func @transform_3(%arg0: i32, %arg1: i32) -> (i32, i32) {
    %c0_i32 = arith.constant 0 : i32
    %c0_i32_0 = arith.constant 0 : i32
    %c0_i32_1 = arith.constant 0 : i32
    return %c0_i32, %c0_i32_0 : i32, i32
  }
  func.func @transform_4(%arg0: i32, %arg1: i32) -> (i32, i32, i32) {
    %c0_i32 = arith.constant 0 : i32
    %c0_i32_0 = arith.constant 0 : i32
    return %arg0, %c0_i32, %arg1 : i32, i32, i32
  }
}

</mosaic_0001>

<bundles_post_ra>
// kernel: tpu_custom_call.1
= control target key start
LH: loop header
LB: loop body
LE: loop exit
PB: predicated region body
PF: predicated region fallthrough
CT: control target
= control target key end

     0   :  { %9 = vsyncpa [#allocation3], 0  ;;  %s943_s0 = inlined_call_operand.vmem [shape: f32[2,4,128], index: 0, kind: input, shape index: {}]   ;;  %s944_s1 = inlined_call_operand.hbm [shape: f32[2,1,4,4], index: 1, kind: input, shape index: {}]   ;;  %s945_s2 = inlined_call_operand.vmem [shape: f32[8,20], index: 2, kind: input, shape index: {}]   ;;  %s946_s3 = inlined_call_operand.vmem [shape: f32[8,1], index: 3, kind: input, shape index: {}]   ;;  %s947_s4 = inlined_call_operand.hbm [shape: f32[2,8,128], index: 4, kind: output, shape index: {}]  }
   0x1   :  { %11 = vsyncpa [#allocation3 + $0x1], 0 }
   0x2   :  { %12 = vsyncpa [#allocation4], 0 }
   0x3   :  { %14 = vsyncpa [#allocation4 + $0x1], 0  ;;  %s756_s15 = smov 0   ;;  %s758_s16 = smov 0  }
   0x4   :  { %s760_s17 = smov 0   ;;  %s762_s18 = smov 0  }
   0x5   :  { %s764_s19 = smov 0   ;;  %s766_s20 = smov 0  }
   0x6 LB: > { %s488_s21 = sadd.s32 4294967295, %s719_s20   ;;  %s489_s22 = sadd.s32 4294967294, %s719_s20   ;;  %s719_s20 = sphi %s766_s20, %s20_s20   ;;  %s715_s19 = sphi %s764_s19, %s963_s19   ;;  %s711_s18 = sphi %s762_s18, %s962_s18   ;;  %s707_s17 = sphi %s760_s17, %s961_s17   ;;  %s703_s16 = sphi %s758_s16, %s960_s16   ;;  %s699_s15 = sphi %s756_s15, %s959_s15  }
   0x7   : > { %s32_s23 = sadd.s32 1, %s715_s19  ;;  %s69_s24 = sadd.s32 1, %s707_s17 }
   0x8   : > { %p34_p0 = scmp.ge.s32.totalorder %s32_s23, 2  ;;  %p76_p1 = scmp.ne.s32.totalorder %s707_s17, %s703_s16 }
   0x9   : > { %p77_p2 = scmp.eq.s32.totalorder %s719_s20, 0  ;;  %p82_p3 = scmp.ne.s32.totalorder %s703_s16, %s699_s15 }
   0xa   : > { %s965_s23 = smov (%p34_p0, %s32_s23), 0  ;;  %p83_p5 = scmp.eq.s32.totalorder %s488_s21, 0 }
   0xb   : > { %p797_p4 = por %p77_p2, %p76_p1  ;;  %s64_s26 = ssub.s32 %s715_s19, %s965_s23 }
   0xc   : > { %p150_p6 = scmp.eq.s32.totalorder %s488_s21, 1  ;;  %p67_p7 = scmp.eq.s32.totalorder %s64_s26, 0 }
   0xd   : > { %p803_p8 = por %p83_p5, %p82_p3  ;;  %p156_p10 = scmp.eq.s32.totalorder %s489_s22, 1 }
   0xe   : > { %p807_p9 = por %p150_p6, %p76_p1  ;;  %p532_p13 = scmp.lt.s32.totalorder %s719_s20, 2 }
   0xf   : > { %s812_s29 = scalar_select %p67_p7, %s707_s17, %s69_s24  }
  0x10   : > { %s951_s28 = scalar_select %p807_p9, 1, 0 }
  0x11   : > { %p814_p11 = por %p156_p10, %p82_p3  ;;  %s192_s5 = sand.u32 1, %s707_s17  }
  0x12   : > { %s492_s6 = sshll.u32 %s192_s5, 2  ;;  %s493_s7 = sshll.u32 %s715_s19, 6 }
  0x13   : > { %s952_s30 = scalar_select %p814_p11, 1, 0 }
  0x14   : > { %s825_s10 = scalar_lea.hbm %s944_s1, %s493_s7  ;;  %s196_s11 = scalar_lea.vmem [#allocation2], %s492_s6 }
  0x15   : > { %s204_s12 = sshll.u32 %s196_s11, 4  ;;  %p831_p0 = pnand %p532_p13, %p797_p4  ;;  %s827_s12 = int_to_ptr.vmem [resolvable:$true] %s204_s12 }
  0x16   : > { %s193_s14 = scalar_lea.sflag [#allocation3], %s192_s5  ;;  %s607_s21 = scalar_lea.hbm %s825_s10, 64 }
  0x17   : > { %p608_p3 = scmp.ne.s32.totalorder %s825_s10, %s607_s21  ;;  %p609_p5 = pneg %p831_p0 }
  0x18   : > { %s612_s25 = scalar_lea.hbm %s944_s1, 128  ;;  %p613_p4 = scmp.lt.u32.totalorder %s825_s10, %s944_s1 }
  0x19   : > { %p610_p6 = pnand %p609_p5, %p608_p3  ;;  %p614_p10 = scmp.lt.u32.totalorder %s612_s25, %s607_s21 }
  0x1a   : > { %p616_p12 = scmp.lt.u32.totalorder %s607_s21, %s825_s10 }
  0x1b   : > { %p611_p7 = pneg %p610_p6  ;;  %p615_p13 = por %p614_p10, %p613_p4 }
  0x1d   : > { %p617_p1 = por %p616_p12, %p615_p13 }
  0x1f   : > { %p618_p2 = pnand %p617_p1, %p611_p7 }
  0x21   : > { %621 = shalt.err (!%p618_p2)
}
  0x22   : > { %s622_s5 = scalar_lea.vmem %s827_s12, 64  ;;  %s721_s7 = smov [#allocation2]  }
  0x23   : > { %p623_p3 = scmp.ne.s32.totalorder %s827_s12, %s622_s5  ;;  %s627_s8 = sshll.u32 %s721_s7, 4  ;;  %s628_s8 = int_to_ptr.vmem [resolvable:$false] %s627_s8 }
  0x24   : > { %s629_s9 = scalar_lea.vmem %s628_s8, 128  ;;  %p630_p9 = scmp.lt.s32.totalorder %s827_s12, %s628_s8 }
  0x25   : > { %p625_p6 = pnand %p623_p3, %p609_p5  ;;  %p631_p4 = scmp.lt.s32.totalorder %s629_s9, %s622_s5 }
  0x27   : > { %p626_p11 = pneg %p625_p6  ;;  %p632_p10 = por %p631_p4, %p630_p9 }
  0x29   : > { %p633_p12 = pnand %p632_p10, %p626_p11 }
  0x2b   : > { %636 = shalt.err (!%p633_p12)
}
  0x2c   : > { %527 = dma.hbm_to_vmem [thread:$0]  (!%p831_p0), %s825_s10, 64, %s827_s12, %s193_s14  }
  0x2d   : > { %p954_p1 = scmp.lt.s32.totalorder %s719_s20, 3  ;;  %p955_p2 = scmp.ge.s32.totalorder %s719_s20, 1 }
  0x2f   : > { %p210_p5 = pnand %p955_p2, %p954_p1 }
  0x30   : > { %s867_s11 = sand.u32 (!%p210_p5), 1, %s703_s16  }
  0x31   : > { %213 = sbr.rel (%p210_p5) target bundleno = 426 (0x1aa), region = 36  ;;  %s495_s21 = sshll.u32 (!%p210_p5), %s867_s11, 2 }
  0x32   : > { %s216_s22 = scalar_lea.sflag (!%p210_p5), [#allocation3], %s867_s11  ;;  %s219_s24 = scalar_lea.vmem (!%p210_p5), [#allocation2], %s495_s21 }
  0x38   : > { %690 = dma.done.wait (%p803_p8), %s216_s22, 64  }
  0x39   : > { %692 = vsyncadd (%p803_p8), %s216_s22, 4294967232  ;;  %p251_p9 = scmp.lt.s32.totalorder %s711_s18, 1  ;;  %v722_v0 = vmov 0.0|0.0   ;;  %v259_v2 = vld [vmem:[%s219_s24] sm:$0xf]  ;;  %s723_s26 = smov 127  }
  0x3a   : > { %517 = vmatprep.subr.bf16.mxu0 %v722_v0  ;;  %v263_v4 = vrot.slane %v259_v2, 4  ;;  %s724_s27 = smov 125   ;;  %vm725_vm0 = vmmov 0   ;;  %v726_v7 = vmov 0.0   ;;  %v727_v8 = vmov 0   ;;  %s728_s6 = smov 126  }
  0x3b   : > { %s252_s10 = scalar_select %p251_p9, %s711_s18, 1  ;;  %514 = vmatprep.mubr.msk.f32.mxu0 %vm725_vm0, %v726_v7  ;;  %605 = vset.pattern.permute.xlu1 %v727_v8  ;;  %v295_v9 = vld [vmem:[%s946_s3] sm:$0xff]  ;;  %vm268_vm1 = vcmask 1039360   ;;  %vm282_vm2 = vcmask 1022976   ;;  %vm275_vm3 = vcmask 1031168   ;;  %vm291_vm4 = vcmask 1043456  }
  0x3c   : > { %606 = vset.pattern.permute.xlu0 %v727_v8  ;;  %s729_s5 = smov 124   ;;  %vm289_vm5 = vcmask 1014784   ;;  %v294_v28 = vld [vmem:[%s945_s2] sm:$0xff]  ;;  %vm301_vm6 = vcmask 162816   ;;  %s496_s22 = sshll.u32 %s867_s11, 3 }
  0x3d   : > { %s497_s12 = sshll.u32 %s252_s10, 2  ;;  %s501_s24 = sshll.u32 %s711_s18, 7 }
  0x3e   : > { %s257_s25 = scalar_lea.vmem %s943_s0, %s497_s12  ;;  %s250_s10 = scalar_lea.vmem [#allocation5], %s496_s22 }
  0x3f   : > { %v258_v1 = vld [vmem:[%s257_s25] sm:$0xf]  ;;  %s393_s12 = sshll.u32 %s250_s10, 4  ;;  %s894_s25 = scalar_lea.hbm %s947_s4, %s501_s24  ;;  %s896_s12 = int_to_ptr.vmem [resolvable:$true] %s393_s12 }
  0x40   : > { %v262_v3 = vrot.slane %v258_v1, 4  ;;  %v595_v6 = vpack.i.bf16 %v259_v2, %v258_v1  ;;  %p956_p11 = scmp.ne.s32.totalorder %s951_s28, 0  ;;  %s730_s18 = smov [#allocation5]  }
  0x42   : > { %v590_v5 = vpack.i.bf16 %v263_v4, %v262_v3 }
  0x44   : > { %591 = vrot.lane.b32.xlu0 %v590_v5, %s723_s26  ;;  %601 = vrot.lane.b32.xlu1 %v590_v5, %s724_s27  ;;  %s379_s26 = scalar_lea.sflag [#allocation4], %s867_s11  ;;  %s637_s27 = scalar_lea.vmem %s896_s12, 128 }
  0x45   : > { %p638_p8 = scmp.ne.s32.totalorder %s896_s12, %s637_s27 }
  0x47   : > { %p639_p0 = pnand %p638_p8, %p956_p11 }
  0x48   : > { %596 = vrot.lane.b32.xlu0 %v595_v6, %s728_s6  ;;  %285 = vrot.lane.b32.xlu1 %v258_v1, %s729_s5  ;;  %s641_s6 = sshll.u32 %s730_s18, 4  ;;  %s642_s6 = int_to_ptr.vmem [resolvable:$false] %s641_s6 }
  0x49   : > { %p640_p7 = pneg %p639_p0  ;;  %p644_p13 = scmp.lt.s32.totalorder %s896_s12, %s642_s6 }
  0x4c   : > { %287 = vrot.lane.b32.xlu0 %v259_v2, %s729_s5  ;;  %298 = vperm.xlu1 %605, %v295_v9   ;;  %s643_s5 = scalar_lea.vmem %s642_s6, 256 }
  0x4d   : > { %p645_p3 = scmp.lt.s32.totalorder %s643_s5, %s637_s27 }
  0x4f   : > { %p646_p6 = por %p645_p3, %p644_p13 }
  0x51   : > { %p647_p4 = pnand %p646_p6, %p640_p7 }
  0xb6   : > { %v592_v10 = vpop.permute.xlu0 %591  ;;  %v602_v11 = vpop.permute.xlu1 %601 }
  0xb7   : > { %v594_v12 = vunpack.i.h.bf16 %v592_v10  ;;  %v593_v13 = vunpack.i.l.bf16 %v592_v10  ;;  %v604_v14 = vunpack.i.h.bf16 %v602_v11  ;;  %v603_v15 = vunpack.i.l.bf16 %v602_v11 }
  0xb9   : > { %v269_v19 = vsel %vm268_vm1, %v593_v13, %v594_v12  ;;  %v283_v20 = vsel %vm282_vm2, %v603_v15, %v604_v14 }
  0xba   : > { %v597_v16 = vpop.permute.xlu0 %596  ;;  %v292_v22 = vsel %vm291_vm4, %v258_v1, %v269_v19  ;;  %v286_v25 = vpop.permute.xlu1 %285 }
  0xbb   : > { %v599_v17 = vunpack.i.h.bf16 %v597_v16  ;;  %v598_v18 = vunpack.i.l.bf16 %v597_v16 }
  0xbd   : > { %v276_v21 = vsel %vm275_vm3, %v598_v18, %v599_v17 }
  0xbe   : > { %v293_v23 = vsel %vm291_vm4, %v276_v21, %v283_v20  ;;  %v288_v26 = vpop.permute.xlu0 %287 }
  0xbf   : > { %v518_v24 = vpack.c.bf16 %v293_v23, %v292_v22  ;;  %v290_v27 = vsel %vm289_vm5, %v286_v25, %v288_v26 }
  0xc1   : > { %519 = vmatpush3.bf16.msra.mxu0 %v518_v24 }
  0xc2   : > { %512 = vmatprep.subr.mxu0 %v726_v7 }
  0xc5   : > { %513 = vmatpush3.msk.msra.mxu0 %vm291_vm4, %v290_v27 }
  0xc6   : > { %515 = vmatmul.mubr.msk.f32.vlgmr.msra.gmra.mrb[0].mxu0 %vm301_vm6, %v294_v28 }
  0xcb   : > { %v299_v29 = vpop.permute.xlu1 %298 }
 0x199   : > { %v373_v30 = vpop.f32.mrb[0].mxu0 }
 0x19a   : > { %v374_v31 = vadd.f32 %v373_v30, %v299_v29  ;;  %v516_v32 = vpop.f32.mrb[1].mxu0 }
 0x19c   : > { %377 = vst [vmem:[%s250_s10] sm:$0xff] %v374_v31 }
 0x19d   : > { %650 = shalt.err (!%p647_p4)
}
 0x19e   : > { %s651_s11 = scalar_lea.hbm %s894_s25, 128  ;;  %s655_s9 = scalar_lea.hbm %s947_s4, 256 }
 0x19f   : > { %p652_p10 = scmp.ne.s32.totalorder %s894_s25, %s651_s11  ;;  %p656_p2 = scmp.lt.u32.totalorder %s894_s25, %s947_s4 }
 0x1a0   : > { %p657_p5 = scmp.lt.u32.totalorder %s655_s9, %s651_s11  ;;  %p659_p8 = scmp.lt.u32.totalorder %s651_s11, %s894_s25 }
 0x1a1   : > { %p653_p12 = pnand %p652_p10, %p956_p11 }
 0x1a2   : > { %p658_p9 = por %p657_p5, %p656_p2 }
 0x1a3   : > { %p654_p1 = pneg %p653_p12 }
 0x1a4   : > { %p660_p0 = por %p659_p8, %p658_p9 }
 0x1a6   : > { %p661_p7 = pnand %p660_p0, %p654_p1 }
 0x1a8   : > { %664 = shalt.err (!%p661_p7)
}
 0x1a9   : > { %522 = dma.vmem_to_hbm [thread:$0]  (%p956_p11), %s896_s12, 128, %s894_s25, %s379_s26  }
 0x1aa PF: > { %s405_s24 = sand.u32 1, %s699_s15   ;;  %p957_p13 = scmp.ne.s32.totalorder %s952_s30, 0 }
 0x1ab   : > { %p958_p3 = scmp.ge.s32.totalorder %s719_s20, 2  ;;  %s406_s10 = scalar_lea.sflag [#allocation4], %s405_s24 }
 0x1ad   : > { %p529_p6 = pnand %p958_p3, %p957_p13 }
 0x1af   : > { %694 = dma.done.wait (!%p529_p6), %s406_s10, 128  }
 0x1b0   : > { %696 = vsyncadd (!%p529_p6), %s406_s10, 4294967168  ;;  %s20_s20 = sadd.s32 1, %s719_s20   ;;  %s959_s15 = smov %s703_s16 }
 0x1b1   : > { %p17_p4 = scmp.ge.s32.totalorder %s20_s20, 4   ;;  %s960_s16 = smov %s707_s17 }
 0x1b2   : > { %s961_s17 = smov %s812_s29  ;;  %s962_s18 = smov %s715_s19 }
 0x1b3   : > { %s963_s19 = smov %s965_s23  ;;  %19 = sbr.rel (!%p17_p4) target bundleno = 6 (0x6), region = 84 }
 0x1ba   :  { %411 = vsyncpa [#allocation3], 1 }
 0x1bb   :  { %413 = vsyncpa [#allocation3 + $0x1], 1 }
 0x1bc   :  { %414 = vsyncpa [#allocation4], 1 }
 0x1bd   :  { %416 = vsyncpa [#allocation4 + $0x1], 1 }

</bundles_post_ra>
